<compile_context>
chip_gen: v5e
topology: v5e:2x2
jax: 0.10.0
libtpu: 0.0.40
codegen_flags: <defaults>
</compile_context>

<pallas_src>
import functools

import jax
import jax.numpy as jnp
from jax.experimental import pallas as pl
from jax.experimental.pallas import tpu as pltpu


def _lraspp_kernel(x_ref, w1t_ref, gate_ref, gbias_ref, o_ref):
    # x_ref:     (Cin, HW_T)   one spatial tile of one image (NCHW, HW flattened)
    # w1t_ref:   (Cout, Cin)   aspp1 1x1-conv weight, BN-scale folded, transposed
    # gate_ref:  (Cout, 1)     per-image sigmoid gate (aspp2)
    # gbias_ref: (Cout, 1)     per-image folded BN bias * gate
    # o_ref:     (Cout, HW_T)  output tile (NCHW layout, HW on lanes)
    y = jnp.dot(w1t_ref[...], x_ref[...], preferred_element_type=jnp.float32)
    # ReLU(conv*scale + bias) * gate == ReLU(conv*scale*gate + bias*gate), gate > 0
    o_ref[...] = jnp.maximum(y * gate_ref[...] + gbias_ref[...], 0.0).astype(o_ref.dtype)


def _pick_hw_tile(hw, max_tile=2048):
    # Lane axis tile: multiple of 128 (unmasked vst) or the full extent.
    if hw % 128 == 0:
        return min(max_tile, hw)
    return hw


@functools.partial(jax.jit, static_argnames=())
def lraspp_forward(x, w1, bn_gamma, bn_beta, bn_mean, bn_var, w2, *, eps=1e-5):
    """x: NCHW (N, Cin, H, W) or (B, T, Cin, H, W). Returns same rank with Cout channels."""
    orig_ndim = x.ndim
    if orig_ndim == 5:
        B, T = x.shape[:2]
        x = x.reshape((B * T,) + x.shape[2:])
    N, Cin, H, W = x.shape
    Cout = w1.shape[1]
    HW = H * W

    # Keep NCHW; just flatten spatial. No transpose round-trips through HBM.
    x_flat = x.reshape(N, Cin, HW)

    f32 = jnp.float32
    # Fold eval-mode BatchNorm into a per-channel affine, then fold the scale
    # into the conv weight.
    scale = bn_gamma.astype(f32) / jnp.sqrt(bn_var.astype(f32) + eps)         # (Cout,)
    bias = bn_beta.astype(f32) - bn_mean.astype(f32) * scale                  # (Cout,)
    w1t = (w1.astype(f32) * scale[None, :]).T.astype(x.dtype)                 # (Cout, Cin)

    # aspp2: per-image gate, computed once (tiny) outside the tiled kernel so
    # the HW grid axis has no cross-tile dependency.
    pooled = jnp.mean(x_flat.astype(f32), axis=2)                             # (N, Cin)
    gate = jax.nn.sigmoid(pooled @ w2.astype(f32))                            # (N, Cout)
    gbias = bias[None, :] * gate                                              # (N, Cout)
    gate3 = gate.reshape(N, Cout, 1)
    gbias3 = gbias.reshape(N, Cout, 1)

    hw_tile = _pick_hw_tile(HW)
    grid = (N, pl.cdiv(HW, hw_tile))

    out_flat = pl.pallas_call(
        _lraspp_kernel,
        out_shape=jax.ShapeDtypeStruct((N, Cout, HW), x.dtype),
        grid_spec=pltpu.PrefetchScalarGridSpec(
            num_scalar_prefetch=0,
            grid=grid,
            in_specs=[
                # one (Cin, hw_tile) spatial tile per grid step; image dim squeezed
                pl.BlockSpec((None, Cin, hw_tile), lambda n, h: (n, 0, h)),
                # weights resident across the whole grid
                pl.BlockSpec((Cout, Cin), lambda n, h: (0, 0)),
                # per-image gate / folded bias
                pl.BlockSpec((None, Cout, 1), lambda n, h: (n, 0, 0)),
                pl.BlockSpec((None, Cout, 1), lambda n, h: (n, 0, 0)),
            ],
            out_specs=pl.BlockSpec((None, Cout, hw_tile), lambda n, h: (n, 0, h)),
        ),
        compiler_params=pltpu.CompilerParams(
            dimension_semantics=("parallel", "parallel"),
            vmem_limit_bytes=48 * 1024 * 1024,
        ),
    )(x_flat, w1t, gate3, gbias3)

    out = out_flat.reshape(N, Cout, H, W)
    if orig_ndim == 5:
        out = out.reshape(B, T, Cout, H, W)
    return out


def _reference_forward(x, w1, bn_gamma, bn_beta, bn_mean, bn_var, w2, eps=1e-5):
    """Pure-JAX reference mirroring the PyTorch module (eval-mode BN)."""
    orig_ndim = x.ndim
    if orig_ndim == 5:
        B, T = x.shape[:2]
        x = x.reshape((B * T,) + x.shape[2:])
    y1 = jnp.einsum("nchw,co->nohw", x, w1)
    y1 = (y1 - bn_mean[None, :, None, None]) / jnp.sqrt(bn_var + eps)[None, :, None, None]
    y1 = y1 * bn_gamma[None, :, None, None] + bn_beta[None, :, None, None]
    y1 = jnp.maximum(y1, 0.0)
    pooled = jnp.mean(x, axis=(2, 3))                       # (N, Cin)
    gate = jax.nn.sigmoid(pooled @ w2)                      # (N, Cout)
    out = y1 * gate[:, :, None, None]
    if orig_ndim == 5:
        out = out.reshape(B, T, out.shape[1], *out.shape[2:])
    return out


if __name__ == "__main__":
    key = jax.random.PRNGKey(0)
    k_x, k_w1, k_w2, k_g, k_b, k_m, k_v, k_xt = jax.random.split(key, 8)

    B, Cin, Cout, H, W = 2, 4, 8, 16, 16

    # Deterministic parameter init (synthetic, not a checkpoint).
    w1 = jax.random.normal(k_w1, (Cin, Cout), jnp.float32) * 0.2   # aspp1 conv weight (Cin, Cout)
    w2 = jax.random.normal(k_w2, (Cin, Cout), jnp.float32) * 0.2   # aspp2 conv weight (Cin, Cout)
    bn_gamma = 1.0 + 0.1 * jax.random.normal(k_g, (Cout,), jnp.float32)
    bn_beta = 0.1 * jax.random.normal(k_b, (Cout,), jnp.float32)
    bn_mean = 0.05 * jax.random.normal(k_m, (Cout,), jnp.float32)
    bn_var = 1.0 + 0.1 * jax.nn.softplus(jax.random.normal(k_v, (Cout,), jnp.float32))

    # 4D input (single-frame path)
    x4 = jax.random.normal(k_x, (B, Cin, H, W), jnp.float32)
    out4 = lraspp_forward(x4, w1, bn_gamma, bn_beta, bn_mean, bn_var, w2)
    out4 = jax.block_until_ready(out4)
    ref4 = _reference_forward(x4, w1, bn_gamma, bn_beta, bn_mean, bn_var, w2)
    assert out4.shape == (B, Cout, H, W)
    assert jnp.allclose(out4, ref4, atol=1e-4, rtol=1e-4)

    # 5D input (time-series path)
    T = 3
    x5 = jax.random.normal(k_xt, (B, T, Cin, H, W), jnp.float32)
    out5 = lraspp_forward(x5, w1, bn_gamma, bn_beta, bn_mean, bn_var, w2)
    out5 = jax.block_until_ready(out5)
    ref5 = _reference_forward(x5, w1, bn_gamma, bn_beta, bn_mean, bn_var, w2)
    assert out5.shape == (B, T, Cout, H, W)
    assert jnp.allclose(out5, ref5, atol=1e-4, rtol=1e-4)

    print("KERNEL_OK")
</pallas_src>

<mosaic_0001>
module attributes {stable_mosaic.version = 11 : i64} {
  func.func @_lraspp_kernel(%arg0: i32, %arg1: i32, %arg2: memref<1x4x256xf32, #tpu.memory_space<vmem>>, %arg3: memref<8x4xf32, #tpu.memory_space<vmem>>, %arg4: memref<1x8x1xf32, #tpu.memory_space<vmem>>, %arg5: memref<1x8x1xf32, #tpu.memory_space<vmem>>, %arg6: memref<1x8x256xf32, #tpu.memory_space<vmem>>) attributes {dimension_semantics = [#tpu.dimension_semantics<parallel>, #tpu.dimension_semantics<parallel>], iteration_bounds = array<i64: 2, 1>, scalar_prefetch = 0 : i64, scratch_operands = 0 : i64, tpu.core_type = #tpu.core_type<tc>, window_params = [{transform_indices = @transform_0, window_bounds = array<i64: 1, 4, 256>}, {pipeline_mode = #tpu.pipeline_mode<synchronous>, transform_indices = @transform_1, window_bounds = array<i64: 8, 4>}, {transform_indices = @transform_2, window_bounds = array<i64: 1, 8, 1>}, {transform_indices = @transform_3, window_bounds = array<i64: 1, 8, 1>}, {transform_indices = @transform_4, window_bounds = array<i64: 1, 8, 256>}]} {
    %c0 = arith.constant 0 : index
    %c0_0 = arith.constant 0 : index
    %0 = vector.load %arg3[%c0, %c0_0] : memref<8x4xf32, #tpu.memory_space<vmem>>, vector<8x4xf32>
    %c0_1 = arith.constant 0 : index
    %c0_2 = arith.constant 0 : index
    %c0_3 = arith.constant 0 : index
    %1 = vector.load %arg2[%c0_1, %c0_2, %c0_3] : memref<1x4x256xf32, #tpu.memory_space<vmem>>, vector<1x4x256xf32>
    %2 = vector.shape_cast %1 : vector<1x4x256xf32> to vector<4x256xf32>
    %cst = arith.constant dense<0.000000e+00> : vector<8x256xf32>
    %3 = tpu.matmul %0, %2, %cst {dimension_numbers = #tpu.dot_dimension_numbers<[1], [0], [0], [1], [0, 0, 1, 1], [], []>} : vector<8x4xf32>, vector<4x256xf32>, vector<8x256xf32> -> vector<8x256xf32>
    %c0_4 = arith.constant 0 : index
    %c0_5 = arith.constant 0 : index
    %c0_6 = arith.constant 0 : index
    %4 = vector.load %arg4[%c0_4, %c0_5, %c0_6] : memref<1x8x1xf32, #tpu.memory_space<vmem>>, vector<1x8x1xf32>
    %5 = vector.shape_cast %4 : vector<1x8x1xf32> to vector<8x1xf32>
    %6 = vector.broadcast %5 : vector<8x1xf32> to vector<8x256xf32>
    %7 = arith.mulf %3, %6 : vector<8x256xf32>
    %c0_7 = arith.constant 0 : index
    %c0_8 = arith.constant 0 : index
    %c0_9 = arith.constant 0 : index
    %8 = vector.load %arg5[%c0_7, %c0_8, %c0_9] : memref<1x8x1xf32, #tpu.memory_space<vmem>>, vector<1x8x1xf32>
    %9 = vector.shape_cast %8 : vector<1x8x1xf32> to vector<8x1xf32>
    %10 = vector.broadcast %9 : vector<8x1xf32> to vector<8x256xf32>
    %11 = arith.addf %7, %10 : vector<8x256xf32>
    %cst_10 = arith.constant 0.000000e+00 : f32
    %12 = vector.broadcast %cst_10 : f32 to vector<8x256xf32>
    %13 = arith.maximumf %11, %12 : vector<8x256xf32>
    %c0_11 = arith.constant 0 : index
    %c0_12 = arith.constant 0 : index
    %c0_13 = arith.constant 0 : index
    %14 = vector.load %arg6[%c0_11, %c0_12, %c0_13] : memref<1x8x256xf32, #tpu.memory_space<vmem>>, vector<1x8x256xf32>
    %15 = vector.shape_cast %14 : vector<1x8x256xf32> to vector<8x256xf32>
    %16 = vector.shape_cast %13 : vector<8x256xf32> to vector<1x8x256xf32>
    tpu.vector_store %arg6[%c0_11, %c0_12, %c0_13], %16 {strides = array<i32>} : memref<1x8x256xf32, #tpu.memory_space<vmem>>, vector<1x8x256xf32>,
    return
  }
  func.func @transform_0(%arg0: i32, %arg1: i32) -> (i32, i32, i32) {
    %c0_i32 = arith.constant 0 : i32
    %c0_i32_0 = arith.constant 0 : i32
    return %arg0, %c0_i32, %arg1 : i32, i32, i32
  }
  func.func @transform_1(%arg0: i32, %arg1: i32) -> (i32, i32) {
    %c0_i32 = arith.constant 0 : i32
    %c0_i32_0 = arith.constant 0 : i32
    %c0_i32_1 = arith.constant 0 : i32
    return %c0_i32, %c0_i32_0 : i32, i32
  }
  func.func @transform_2(%arg0: i32, %arg1: i32) -> (i32, i32, i32) {
    %c0_i32 = arith.constant 0 : i32
    %c0_i32_0 = arith.constant 0 : i32
    %c0_i32_1 = arith.constant 0 : i32
    return %arg0, %c0_i32, %c0_i32_0 : i32, i32, i32
  }
  func.func @transform_3(%arg0: i32, %arg1: i32) -> (i32, i32, i32) {
    %c0_i32 = arith.constant 0 : i32
    %c0_i32_0 = arith.constant 0 : i32
    %c0_i32_1 = arith.constant 0 : i32
    return %arg0, %c0_i32, %c0_i32_0 : i32, i32, i32
  }
  func.func @transform_4(%arg0: i32, %arg1: i32) -> (i32, i32, i32) {
    %c0_i32 = arith.constant 0 : i32
    %c0_i32_0 = arith.constant 0 : i32
    return %arg0, %c0_i32, %arg1 : i32, i32, i32
  }
}

</mosaic_0001>

<bundles_post_ra>
// kernel: lraspp_forward.1
= control target key start
LH: loop header
LB: loop body
LE: loop exit
PB: predicated region body
PF: predicated region fallthrough
CT: control target
= control target key end

     0   :  { %s552_s15 = smov 0   ;;  %s554_s16 = smov 0   ;;  %s598_s0 = inlined_call_operand.vmem [shape: f32[2,4,256], index: 0, kind: input, shape index: {}]   ;;  %s599_s1 = inlined_call_operand.vmem [shape: f32[8,4], index: 1, kind: input, shape index: {}]   ;;  %s600_s2 = inlined_call_operand.vmem [shape: f32[2,8,1], index: 2, kind: input, shape index: {}]   ;;  %s601_s3 = inlined_call_operand.vmem [shape: f32[2,8,1], index: 3, kind: input, shape index: {}]   ;;  %s602_s4 = inlined_call_operand.vmem [shape: f32[2,8,256], index: 4, kind: output, shape index: {}]  }
   0x1   :  { %s556_s17 = smov 0  }
   0x2 LB: > { %s26_s18 = sadd.s32 1, %s520_s16  ;;  %p461_p0 = scmp.ge.s32.totalorder %s524_s17, 1  ;;  %s524_s17 = sphi %s556_s17, %s14_s17   ;;  %s520_s16 = sphi %s554_s16, %s604_s16   ;;  %s516_s15 = sphi %s552_s15, %s603_s15  }
   0x3   : > { %p28_p1 = scmp.ge.s32.totalorder %s26_s18, 2  ;;  %p201_p2 = scmp.lt.s32.totalorder %s524_s17, 3 }
   0x5   : > { %s606_s18 = smov (%p28_p1, %s26_s18), 0  ;;  %p202_p3 = pnand %p461_p0, %p201_p2 }
   0x6   : > { %p244_p4 = scmp.lt.s32.totalorder (!%p202_p3), %s516_s15, 1 }
   0x7   : > { %205 = sbr.rel (%p202_p3) target bundleno = 160 (0xa0), region = 36 }
   0xc   : > { %v526_v0 = vmov 0   ;;  %s608_s15 = smov (!%p244_p4, %s516_s15), 1  ;;  %vm281_vm0 = vcmask 1043456   ;;  %v271_v3 = vld [vmem:[%s599_s1] sm:$0xff]  ;;  %vm277_vm1 = vcmask 31744  }
   0xd   : > { %501 = vset.pattern.permute.xlu0 %v526_v0  ;;  %s474_s19 = sshll.u32 %s608_s15, 3  ;;  %s475_s5 = sshll.u32 %s608_s15, 4 }
   0xe   : > { %s256_s22 = scalar_lea.vmem %s600_s2, %s474_s19  ;;  %s251_s25 = scalar_lea.vmem %s598_s0, %s474_s19 }
   0xf   : > { %v326_v1 = vld [vmem:[%s256_s22] sm:$0xff]  ;;  %s260_s28 = scalar_lea.vmem %s601_s3, %s474_s19  ;;  %s269_s8 = scalar_lea.vmem %s602_s4, %s475_s5 }
  0x10   : > { %v272_v2 = vld [vmem:[%s251_s25] sm:$0xff]  ;;  %329 = vperm.xlu0 %501, %v326_v1  }
  0x11   : > { %274 = vst [vmem:[#allocation1] ss:$2 sm:$0xff] %v272_v2  ;;  %v334_v4 = vld [vmem:[%s260_s28] sm:$0xff] }
  0x18   : > { %v275_v5 = vld.sshfl [vmem:[#allocation1] sm:$0xff pattern:$0x75316420]  ;;  %v276_v6 = vld.sshfl [vmem:[#allocation1 + $0x8] sm:$0xff pattern:$0x75316420]  ;;  %337 = vperm.xlu0 %501, %v334_v4  }
  0x19   : > { %468 = vmatpush.msk.msra.mxu0 %vm281_vm0, %v275_v5  ;;  %470 = vmatpush.msk.msra.mxu1 %vm281_vm0, %v276_v6 }
  0x1a   : > { %469 = vmatmul.msk.f32.vlgmr.msra.gmra.mxu0 %vm277_vm1, %v271_v3  ;;  %471 = vmatmul.msk.f32.vlgmr.msra.gmra.mxu1 %vm277_vm1, %v271_v3 }
  0x82   : > { %v330_v7 = vpop.permute.xlu0 %329 }
  0x8a   : > { %v338_v12 = vpop.permute.xlu0 %337 }
  0x97   : > { %v303_v8 = vpop.f32.mrf.mxu0  ;;  %v323_v9 = vpop.f32.mrf.mxu1 }
  0x98   : > { %v332_v10 = vmul.f32 %v330_v7, %v303_v8  ;;  %v333_v11 = vmul.f32 %v330_v7, %v323_v9 }
  0x9a   : > { %v340_v13 = vadd.f32 %v338_v12, %v332_v10  ;;  %v341_v14 = vadd.f32 %v338_v12, %v333_v11 }
  0x9c   : > { %v342_v15 = vmax.f32 %v340_v13, 0.0  ;;  %v343_v16 = vmax.f32 %v341_v14, 0.0 }
  0x9e   : > { %344 = vst [vmem:[%s269_s8] sm:$0xff] %v342_v15 }
  0x9f   : > { %345 = vst [vmem:[%s269_s8 + $0x8] sm:$0xff] %v343_v16 }
  0xa0 PF: > { %s14_s17 = sadd.s32 1, %s524_s17   ;;  %s603_s15 = smov %s520_s16 }
  0xa1   : > { %p11_p5 = scmp.ge.s32.totalorder %s14_s17, 4   ;;  %s604_s16 = smov %s606_s18 }
  0xa3   :  { %13 = sbr.rel (!%p11_p5) target bundleno = 2 (0x2), region = 72 }

</bundles_post_ra>
